<compile_context>
chip_gen: v6e
topology: v6e:2x2x1
jax: 0.10.0
libtpu: 0.0.40
codegen_flags: <defaults>
</compile_context>

<pallas_src>
import functools
import math

import jax
import jax.numpy as jnp
from jax.experimental import pallas as pl
from jax.experimental.pallas import tpu as pltpu

_EPS = 1e-6                      # matches the PyTorch module: log(onehot + 1e-6)
_LOG_EPS = math.log(_EPS)        # log(1e-6)
_LOG1P_EPS = math.log1p(_EPS)    # log(1 + 1e-6)


def _round_up(x, m):
    return (x + m - 1) // m * m


def _vmem_budget():
    """(per-input-tile f32-equivalent byte budget, vmem_limit_bytes) per generation."""
    try:
        cap = int(pltpu.get_tpu_info().vmem_capacity_bytes)
    except Exception:
        cap = 64 * 1024 * 1024                       # assume v7x-like (smallest VMEM)
    if cap >= 96 * 1024 * 1024:                      # v5e / v6e: 128 MiB physical
        return 12 * 1024 * 1024, 100 * 1024 * 1024
    return 5 * 1024 * 1024, 48 * 1024 * 1024         # v7x: 64 MiB per TensorCore


def _sce_partial_kernel(logits_ref, targets_ref, out_ref, *, n_valid):
    """Per-tile partial sums of CE and RCE.

    logits_ref:  (TILE_N, C) input dtype (cast to f32 in-kernel); remainder-tile rows
                 past n_valid hold unspecified data and are masked below.
    targets_ref: (TILE_N, 1) int32 class indices.
    out_ref:     (1, 2, 128) f32; [0,0,:] = sum(ce_i), [0,1,:] = sum(rce_i) over valid rows.
    """
    i = pl.program_id(0)
    logits = logits_ref[...].astype(jnp.float32)               # (TN, C)
    tgt = targets_ref[...]                                      # (TN, 1) i32
    tn, c = logits.shape

    # one-hot via iota compare.
    col = jax.lax.broadcasted_iota(jnp.int32, (tn, c), 1)
    onehot = col == tgt                                         # (TN, C) bool

    # numerically stable log-sum-exp pieces: a single exp pass over the tile.
    m = jnp.max(logits, axis=1, keepdims=True)                  # (TN, 1)
    shifted = logits - m                                        # (TN, C)
    sum_ex = jnp.sum(jnp.exp(shifted), axis=1, keepdims=True)   # (TN, 1)
    shifted_t = jnp.sum(jnp.where(onehot, shifted, 0.0),
                        axis=1, keepdims=True)                  # (TN, 1) target logit - m

    # cross entropy per row: -log softmax[target] = log(sum_exp) - shifted_target
    ce_per = jnp.log(sum_ex) - shifted_t                        # (TN, 1)

    # reverse CE per row; sum(pred) == 1 so only p_t is needed.  Exact (no approx
    # reciprocal): p_t = softmax[target] = exp(-ce_per).
    p_t = jnp.exp(-ce_per)
    rce_per = -(p_t * _LOG1P_EPS + (1.0 - p_t) * _LOG_EPS)      # (TN, 1)

    # Mask rows past the true batch size (remainder tile).  Must be a select, not a
    # multiply: out-of-bounds rows hold unspecified data (possibly NaN/Inf).
    row = jax.lax.broadcasted_iota(jnp.int32, (tn, 1), 0) + i * tn
    valid = row < n_valid
    ce_partial = jnp.sum(jnp.where(valid, ce_per, 0.0))
    rce_partial = jnp.sum(jnp.where(valid, rce_per, 0.0))

    # Lane-dense partial-sum block: sublane 0 carries CE, sublane 1 carries RCE.
    sel = jax.lax.broadcasted_iota(jnp.int32, (1, 2, 128), 1)
    out_ref[...] = jnp.where(sel == 0, ce_partial, rce_partial)


def symmetric_cross_entropy_loss(logits, targets, alpha=1.0, beta=1.0, tile_n=None):
    """JAX wrapper: logits [N, C] float, targets [N] int -> scalar float32 loss."""
    n, c = logits.shape
    budget, vmem_limit = _vmem_budget()

    auto_tile = tile_n is None
    if auto_tile:
        # Per-row f32 working-set bytes (lane-padded); the cast/shifted temporaries
        # dominate the per-step VMEM footprint, not the raw (possibly bf16) input.
        row_f32_bytes = _round_up(max(c, 128), 128) * 4
        tile_n = (budget // row_f32_bytes) // 8 * 8
        tile_n = max(8, min(tile_n, 8192))
        # Keep >= 2 tiles when the batch allows it so v7x's two TensorCores both work.
        if n >= 16:
            tile_n = min(tile_n, _round_up(-(-n // 2), 8))
    tile_n = max(8, min(tile_n, _round_up(n, 8)))
    num_tiles = -(-n // tile_n)

    t = targets.astype(jnp.int32).reshape(n, 1)

    # TODO(synk): n_valid is baked in statically; pass it via scalar prefetch / SMEM
    # if the batch size varies at runtime to avoid recompiles.
    partials = pl.pallas_call(
        functools.partial(_sce_partial_kernel, n_valid=n),
        out_shape=jax.ShapeDtypeStruct((num_tiles, 2, 128), jnp.float32),
        grid=(num_tiles,),
        in_specs=[
            # Last block dim == full class dim C: legal even when C % 128 != 0, and it
            # avoids any wrapper-side padding copy of the logits in HBM.
            pl.BlockSpec((tile_n, c), lambda i: (i, 0)),
            pl.BlockSpec((tile_n, 1), lambda i: (i, 0)),
        ],
        out_specs=pl.BlockSpec((1, 2, 128), lambda i: (i, 0, 0)),
        compiler_params=pltpu.CompilerParams(
            dimension_semantics=("parallel",),
            vmem_limit_bytes=vmem_limit,
        ),
    )(logits, t)

    ce_sum = jnp.sum(partials[:, 0, 0])
    rce_sum = jnp.sum(partials[:, 1, 0])
    inv_n = jnp.float32(1.0 / float(n))
    return (jnp.float32(alpha) * ce_sum + jnp.float32(beta) * rce_sum) * inv_n


def _reference_sce(logits, targets, alpha=1.0, beta=1.0):
    """Pure-JAX reference mirroring the PyTorch module's forward."""
    logits = logits.astype(jnp.float32)
    c = logits.shape[1]
    log_probs = jax.nn.log_softmax(logits, axis=1)
    pred = jax.nn.softmax(logits, axis=1)
    onehot = jax.nn.one_hot(targets, c, dtype=jnp.float32)
    ce = -jnp.mean(jnp.sum(onehot * log_probs, axis=1))
    rce = jnp.mean(jnp.sum(-pred * jnp.log(onehot + 1e-6), axis=1))
    return alpha * ce + beta * rce


if __name__ == "__main__":
    key = jax.random.PRNGKey(0)
    k1, k2, k3, k4 = jax.random.split(key, 4)

    # Case 1: batch=8, classes=32 (C not a multiple of 128; single tile).
    N, C = 8, 32
    logits = jax.random.normal(k1, (N, C), dtype=jnp.float32)
    targets = jax.random.randint(k2, (N,), 0, C, dtype=jnp.int32)
    loss = symmetric_cross_entropy_loss(logits, targets, alpha=1.0, beta=1.0)
    loss = jax.block_until_ready(loss)
    ref = _reference_sce(logits, targets, 1.0, 1.0)
    assert jnp.allclose(loss, ref, rtol=1e-5, atol=1e-4), (loss, ref)

    # Case 2: remainder rows + multiple tiles + non-trivial alpha/beta.
    N2, C2 = 13, 160
    logits2 = jax.random.normal(k3, (N2, C2), dtype=jnp.float32)
    targets2 = jax.random.randint(k4, (N2,), 0, C2, dtype=jnp.int32)
    loss2 = symmetric_cross_entropy_loss(logits2, targets2, alpha=0.5, beta=2.0, tile_n=8)
    loss2 = jax.block_until_ready(loss2)
    ref2 = _reference_sce(logits2, targets2, 0.5, 2.0)
    assert jnp.allclose(loss2, ref2, rtol=1e-5, atol=1e-4), (loss2, ref2)

    print("KERNEL_OK")
</pallas_src>

<mosaic_0001>
module attributes {stable_mosaic.version = 11 : i64} {
  func.func @_sce_partial_kernel(%arg0: i32, %arg1: memref<8x32xf32, #tpu.memory_space<vmem>>, %arg2: memref<8x1xi32, #tpu.memory_space<vmem>>, %arg3: memref<1x2x128xf32, #tpu.memory_space<vmem>>) attributes {dimension_semantics = [#tpu.dimension_semantics<parallel>], iteration_bounds = array<i64: 1>, scalar_prefetch = 0 : i64, scratch_operands = 0 : i64, tpu.core_type = #tpu.core_type<tc>, window_params = [{transform_indices = @transform_0, window_bounds = array<i64: 8, 32>}, {transform_indices = @transform_1, window_bounds = array<i64: 8, 1>}, {transform_indices = @transform_2, window_bounds = array<i64: 1, 2, 128>}]} {
    %c0 = arith.constant 0 : index
    %c0_0 = arith.constant 0 : index
    %0 = vector.load %arg1[%c0, %c0_0] : memref<8x32xf32, #tpu.memory_space<vmem>>, vector<8x32xf32>
    %c0_1 = arith.constant 0 : index
    %c0_2 = arith.constant 0 : index
    %1 = vector.load %arg2[%c0_1, %c0_2] : memref<8x1xi32, #tpu.memory_space<vmem>>, vector<8x1xi32>
    %2 = tpu.iota {dimensions = array<i32: 1>} : vector<8x32xi32>
    %3 = vector.broadcast %1 : vector<8x1xi32> to vector<8x32xi32>
    %4 = arith.cmpi eq, %2, %3 : vector<8x32xi32>
    %cst = arith.constant dense<0xFF800000> : vector<8xf32>
    %5 = vector.multi_reduction <maximumf>, %0, %cst [1] : vector<8x32xf32> to vector<8xf32>
    %6 = vector.shape_cast %5 : vector<8xf32> to vector<8x1xf32>
    %7 = vector.broadcast %6 : vector<8x1xf32> to vector<8x32xf32>
    %8 = arith.subf %0, %7 : vector<8x32xf32>
    %9 = math.exp %8 : vector<8x32xf32>
    %cst_3 = arith.constant dense<0.000000e+00> : vector<8xf32>
    %10 = vector.multi_reduction <add>, %9, %cst_3 [1] : vector<8x32xf32> to vector<8xf32>
    %11 = vector.shape_cast %10 : vector<8xf32> to vector<8x1xf32>
    %cst_4 = arith.constant 0.000000e+00 : f32
    %12 = vector.broadcast %cst_4 : f32 to vector<8x32xf32>
    %13 = arith.select %4, %8, %12 : vector<8x32xi1>, vector<8x32xf32>
    %cst_5 = arith.constant dense<0.000000e+00> : vector<8xf32>
    %14 = vector.multi_reduction <add>, %13, %cst_5 [1] : vector<8x32xf32> to vector<8xf32>
    %15 = vector.shape_cast %14 : vector<8xf32> to vector<8x1xf32>
    %16 = math.log %11 : vector<8x1xf32>
    %17 = arith.subf %16, %15 : vector<8x1xf32>
    %cst_6 = arith.constant 0.000000e+00 : f32
    %18 = vector.broadcast %cst_6 : f32 to vector<8x1xf32>
    %19 = arith.subf %18, %17 : vector<8x1xf32>
    %20 = math.exp %19 : vector<8x1xf32>
    %cst_7 = arith.constant 9.99999543E-7 : f32
    %21 = vector.broadcast %cst_7 : f32 to vector<8x1xf32>
    %22 = arith.mulf %20, %21 : vector<8x1xf32>
    %cst_8 = arith.constant 1.000000e+00 : f32
    %23 = vector.broadcast %cst_8 : f32 to vector<8x1xf32>
    %24 = arith.subf %23, %20 : vector<8x1xf32>
    %cst_9 = arith.constant -13.8155107 : f32
    %25 = vector.broadcast %cst_9 : f32 to vector<8x1xf32>
    %26 = arith.mulf %24, %25 : vector<8x1xf32>
    %27 = arith.addf %22, %26 : vector<8x1xf32>
    %cst_10 = arith.constant 0.000000e+00 : f32
    %28 = vector.broadcast %cst_10 : f32 to vector<8x1xf32>
    %29 = arith.subf %28, %27 : vector<8x1xf32>
    %30 = tpu.iota {dimensions = array<i32: 0>} : vector<8x1xi32>
    %c8_i32 = arith.constant 8 : i32
    %31 = arith.muli %arg0, %c8_i32 : i32
    %32 = vector.broadcast %31 : i32 to vector<8x1xi32>
    %33 = arith.addi %30, %32 : vector<8x1xi32>
    %c8_i32_11 = arith.constant 8 : i32
    %34 = vector.broadcast %c8_i32_11 : i32 to vector<8x1xi32>
    %35 = arith.cmpi slt, %33, %34 : vector<8x1xi32>
    %cst_12 = arith.constant 0.000000e+00 : f32
    %36 = vector.broadcast %cst_12 : f32 to vector<8x1xf32>
    %37 = arith.select %35, %17, %36 : vector<8x1xi1>, vector<8x1xf32>
    %38 = vector.shape_cast %37 : vector<8x1xf32> to vector<1x8x1xf32>
    %cst_13 = arith.constant dense<0.000000e+00> : vector<1xf32>
    %39 = vector.multi_reduction <add>, %38, %cst_13 [1, 2] : vector<1x8x1xf32> to vector<1xf32>
    %40 = vector.shape_cast %39 : vector<1xf32> to vector<1x1x1xf32>
    %41 = vector.extract %40[0, 0, 0] : f32 from vector<1x1x1xf32>
    %cst_14 = arith.constant 0.000000e+00 : f32
    %42 = vector.broadcast %cst_14 : f32 to vector<8x1xf32>
    %43 = arith.select %35, %29, %42 : vector<8x1xi1>, vector<8x1xf32>
    %44 = vector.shape_cast %43 : vector<8x1xf32> to vector<1x8x1xf32>
    %cst_15 = arith.constant dense<0.000000e+00> : vector<1xf32>
    %45 = vector.multi_reduction <add>, %44, %cst_15 [1, 2] : vector<1x8x1xf32> to vector<1xf32>
    %46 = vector.shape_cast %45 : vector<1xf32> to vector<1x1x1xf32>
    %47 = vector.extract %46[0, 0, 0] : f32 from vector<1x1x1xf32>
    %48 = tpu.iota {dimensions = array<i32: 1>} : vector<1x2x128xi32>
    %c0_i32 = arith.constant 0 : i32
    %49 = vector.broadcast %c0_i32 : i32 to vector<1x2x128xi32>
    %50 = arith.cmpi eq, %48, %49 : vector<1x2x128xi32>
    %51 = vector.broadcast %41 : f32 to vector<1x2x128xf32>
    %52 = vector.broadcast %47 : f32 to vector<1x2x128xf32>
    %53 = arith.select %50, %51, %52 : vector<1x2x128xi1>, vector<1x2x128xf32>
    %c0_16 = arith.constant 0 : index
    %c0_17 = arith.constant 0 : index
    %c0_18 = arith.constant 0 : index
    %54 = vector.load %arg3[%c0_16, %c0_17, %c0_18] : memref<1x2x128xf32, #tpu.memory_space<vmem>>, vector<1x2x128xf32>
    tpu.vector_store %arg3[%c0_16, %c0_17, %c0_18], %53 {strides = array<i32>} : memref<1x2x128xf32, #tpu.memory_space<vmem>>, vector<1x2x128xf32>,
    return
  }
  func.func @transform_0(%arg0: i32) -> (i32, i32) {
    %c0_i32 = arith.constant 0 : i32
    %c0_i32_0 = arith.constant 0 : i32
    return %arg0, %c0_i32 : i32, i32
  }
  func.func @transform_1(%arg0: i32) -> (i32, i32) {
    %c0_i32 = arith.constant 0 : i32
    %c0_i32_0 = arith.constant 0 : i32
    return %arg0, %c0_i32 : i32, i32
  }
  func.func @transform_2(%arg0: i32) -> (i32, i32, i32) {
    %c0_i32 = arith.constant 0 : i32
    %c0_i32_0 = arith.constant 0 : i32
    %c0_i32_1 = arith.constant 0 : i32
    return %arg0, %c0_i32, %c0_i32_0 : i32, i32, i32
  }
}

</mosaic_0001>

<bundles_post_ra>
// kernel: tpu_custom_call.1
= control target key start
LH: loop header
LB: loop body
LE: loop exit
PB: predicated region body
PF: predicated region fallthrough
CT: control target
= control target key end

     0   :  { %vm20_vm0 = vcmask 261120   ;;  %s157_s0 = inlined_call_operand.vmem [shape: f32[8,32], index: 0, kind: input, shape index: {}]   ;;  %s158_s1 = inlined_call_operand.vmem [shape: s32[8,1], index: 1, kind: input, shape index: {}]   ;;  %s159_s2 = inlined_call_operand.hbm [shape: f32[1,2,128], index: 2, kind: output, shape index: {}]  }
   0x1   :  { %v12_v0 = vld [vmem:[%s157_s0] sm:$0xff] }
   0x2   :  { %7 = vsyncpa [#allocation3], 0  ;;  %v21_v1 = vsel %vm20_vm0, %v12_v0, -inf  ;;  %v128_v2 = vmov 0   ;;  %v13_v3 = vld [vmem:[%s158_s1] sm:$0xff]  ;;  %v14_v7 = vlaneseq  ;;  %vm52_vm2 = vcmask 7168  }
   0x3   :  { %99 = vset.pattern.permute.xlu0 %v128_v2  ;;  %s129_s1 = smov [#allocation2]  }
   0x4   :  { %22 = vmax.xlane.f32.xlu0 %v21_v1  ;;  %v15_v8 = vand.u32 127, %v14_v7  ;;  %v46_v43 = vshrl.u32 %v14_v7, 7  ;;  %s85_s13 = sshll.u32 %s129_s1, 4  ;;  %s86_s13 = int_to_ptr.vmem [resolvable:$true] %s85_s13 }
   0x5   :  { %s106_s15 = scalar_lea.vmem %s86_s13, 32  ;;  %p111_p1 = scmp.lt.s32.totalorder %s86_s13, %s86_s13 }
   0x6   :  { %vm74_vm3 = vcmp.eq.s32.totalorder %v46_v43, 0  ;;  %p107_p0 = scmp.ne.s32.totalorder %s86_s13, %s106_s15  ;;  %p112_p2 = scmp.lt.s32.totalorder %s106_s15, %s106_s15 }
   0x8   :  { %p113_p3 = por %p112_p2, %p111_p1 }
   0xa   :  { %p114_p4 = pnand %p113_p3, %p107_p0 }
  0x1a   :  { %17 = vperm.xlu0 %99, %v13_v3  }
  0x8d   :  { %v23_v4 = vpop.xlane.xlu0 %22 }
  0x8e   :  { %v24_v5 = vsub.f32 %v12_v0, %v23_v4 }
  0x90   :  { %v25_v6 = vmul.f32 1.442695, %v24_v5 }
  0x92   :  { %100 = vpow2.f32 %v25_v6 }
  0x95   :  { %v18_v9 = vpop.permute.xlu0 %17 }
  0x96   :  { %vm19_vm1 = vcmp.eq.s32.totalorder %v15_v8, %v18_v9 }
  0x97   :  { %v30_v12 = vsel %vm19_vm1, %v24_v5, 0.0 }
  0x98   :  { %v31_v13 = vsel %vm20_vm0, %v30_v12, 0.0 }
  0x9f   :  { %v101_v10 = vpop.eup %100 }
  0xa0   :  { %v27_v11 = vsel %vm20_vm0, %v101_v10, 0.0 }
  0xa1   :  { %28 = vadd.xlane.f32.xlu1 %v27_v11 }
  0xa5   :  { %32 = vadd.xlane.f32.xlu1 %v31_v13 }
 0x12a   :  { %v29_v14 = vpop.xlane.xlu1 %28 }
 0x12b   :  { %102 = vlog2.f32 %v29_v14 }
 0x12e   :  { %v33_v17 = vpop.xlane.xlu1 %32 }
 0x138   :  { %v103_v15 = vpop.eup %102 }
 0x139   :  { %v35_v16 = vmul.f32 0.6931472, %v103_v15 }
 0x13b   :  { %v36_v18 = vsub.f32 %v35_v16, %v33_v17 }
 0x13d   :  { %v37_v19 = vsub.f32 0.0, %v36_v18  ;;  %v53_v20 = vsel %vm52_vm2, %v36_v18, 0.0 }
 0x13e   :  { %54 = vadd.xlane.f32.xlu1 %v53_v20 }
 0x13f   :  { %v38_v21 = vmul.f32 1.442695, %v37_v19 }
 0x141   :  { %104 = vpow2.f32 %v38_v21 }
 0x14e   :  { %v105_v22 = vpop.eup %104 }
 0x14f   :  { %v41_v23 = vsub.f32 1.0, %v105_v22  ;;  %v40_v24 = vmul.f32 9.999995e-07, %v105_v22 }
 0x151   :  { %v42_v25 = vmul.f32 -13.815511, %v41_v23 }
 0x153   :  { %v43_v26 = vadd.f32 %v42_v25, %v40_v24 }
 0x155   :  { %v44_v27 = vsub.f32 0.0, %v43_v26 }
 0x157   :  { %v64_v28 = vsel %vm52_vm2, %v44_v27, 0.0 }
 0x158   :  { %65 = vadd.xlane.f32.xlu1 %v64_v28 }
 0x1c7   :  { %v55_v29 = vpop.xlane.xlu1 %54 }
 0x1c8   :  { %v56_v30 = vrot.slane %v55_v29, 4 }
 0x1ca   :  { %v57_v31 = vadd.f32 %v56_v30, %v55_v29 }
 0x1cc   :  { %v58_v32 = vrot.slane %v57_v31, 2 }
 0x1ce   :  { %v59_v33 = vadd.f32 %v58_v32, %v57_v31 }
 0x1d0   :  { %v60_v34 = vrot.slane %v59_v33, 1 }
 0x1d2   :  { %v61_v35 = vadd.f32 %v60_v34, %v59_v33 }
 0x1d4   :  { %93 = vpush %v61_v35 }
 0x1e1   :  { %v66_v36 = vpop.xlane.xlu1 %65 }
 0x1e2   :  { %v67_v37 = vrot.slane %v66_v36, 4 }
 0x1e4   :  { %v68_v38 = vadd.f32 %v67_v37, %v66_v36 }
 0x1e6   :  { %v69_v39 = vrot.slane %v68_v38, 2 }
 0x1e8   :  { %v70_v40 = vadd.f32 %v69_v39, %v68_v38 }
 0x1ea   :  { %v71_v41 = vrot.slane %v70_v40, 1 }
 0x1ec   :  { %v72_v42 = vadd.f32 %v71_v41, %v70_v40 }
 0x1ee   :  { %95 = vpush %v72_v42 }
 0x205   :  { %s94_s0 = spop %93 }
 0x206   :  { %v75_v44 = vstv %s94_s0 }
 0x21f   :  { %s96_s14 = spop %95 }
 0x220   :  { %v76_v45 = vstv %s96_s14 }
 0x221   :  { %v77_v46 = vsel %vm74_vm3, %v75_v44, %v76_v45 }
 0x222   :  { %78 = vst [vmem:[#allocation2] sm:$0x3] %v77_v46 }
 0x223   :  { %117 = shalt.err (!%p114_p4)
}
 0x224   :  { %88 = dma.vmem_to_hbm [thread:$0]  %s86_s13, 32, %s159_s2, [#allocation3]  }
 0x225   :  { %126 = dma.done.wait [#allocation3], 32  }
 0x226   :  { %127 = vsyncadd [#allocation3], 4294967264 }
 0x227   :  { %92 = vsyncpa [#allocation3], 1 }

</bundles_post_ra>
